<compile_context>
chip_gen: v5e
topology: v5e:2x2
jax: 0.10.0
libtpu: 0.0.40
codegen_flags: <defaults>
</compile_context>

<pallas_src>
import functools

import jax
import jax.numpy as jnp
from jax.experimental import pallas as pl
from jax.experimental.pallas import tpu as pltpu


def _round_up(x, m):
    return ((x + m - 1) // m) * m


def _vmem_capacity_bytes():
    """Physical VMEM per TensorCore; falls back to 128 MiB if query fails."""
    try:
        info = pltpu.get_tpu_info()
        cap = getattr(info, "vmem_capacity_bytes", None)
        if cap:
            return int(cap)
    except Exception:
        pass
    return 128 << 20


def _choose_tk(I, tk_req):
    """Pick the intermediate-dim tile. Returns (tk, i_pad).

    Prefers a 128-multiple divisor of I <= tk_req; otherwise pads I (weights are
    re-laid-out once in the wrapper anyway). Never requests a full (H, I) block.
    """
    if I % tk_req == 0 and (tk_req == I or tk_req % 128 == 0):
        return tk_req, 0
    best = 0
    t = 128
    while t <= min(tk_req, I):
        if I % t == 0:
            best = t
        t += 128
    if best:
        return best, 0
    if I <= tk_req:
        return I, 0  # small intermediate: single block
    I_pad = _round_up(I, tk_req)
    return tk_req, I_pad - I


def _vmem_estimate(tm, tk, H, xb, wb):
    """Rough VMEM footprint for the chosen tiles (double-buffered operands)."""
    return (2 * tm * H * xb            # x tile
            + 2 * tm * H * xb          # output tile
            + 2 * H * (2 * tk) * wb    # fused [gate|up] weight block
            + 2 * tk * H * wb          # down weight block
            + tm * H * 4               # f32 accumulator scratch
            + 2 * tm * (2 * tk) * 4)   # gu / h f32 intermediates


def _swiglu_kernel(x_ref, wgu_ref, wd_ref, o_ref, acc_ref, *, tk):
    # x_ref  : (tm, H)     token tile (resident across the k axis)
    # wgu_ref: (H, 2*tk)   fused [gate_k | up_k] weight block (streamed over I)
    # wd_ref : (tk, H)     down_proj weight block (streamed over I)
    # o_ref  : (tm, H)     output tile (written once, at the last k step)
    # acc_ref: (tm, H)     f32 VMEM accumulator, persistent across the k axis
    k = pl.program_id(1)
    last = pl.num_programs(1) - 1

    @pl.when(k == 0)
    def _():
        acc_ref[...] = jnp.zeros_like(acc_ref)

    x = x_ref[...]
    # Single fused gate+up matmul: native-dtype operands on the MXU, f32 accumulation.
    gu = jnp.dot(x, wgu_ref[...], preferred_element_type=jnp.float32)  # (tm, 2*tk)
    g = gu[:, :tk]
    u = gu[:, tk:]
    h = (g * jax.nn.sigmoid(g)) * u
    partial = jnp.dot(h.astype(wd_ref.dtype), wd_ref[...],
                      preferred_element_type=jnp.float32)

    @pl.when(k != last)
    def _():
        acc_ref[...] += partial

    @pl.when(k == last)
    def _():
        o_ref[...] = (acc_ref[...] + partial).astype(o_ref.dtype)


def feed_forward(x, w_gate, w_up, w_down, *, tm=None, tk=None):
    """x: [B, S, H] -> [B, S, H] via SwiGLU MLP (dense base path) in Pallas."""
    B, S, H = x.shape
    I = w_gate.shape[1]
    T = B * S

    xb = jnp.dtype(x.dtype).itemsize
    wb = jnp.dtype(w_gate.dtype).itemsize

    # --- hardware-derived VMEM budget (v5e/v6e: 128 MiB, v7x: 64 MiB per TC) ---
    vmem_cap = _vmem_capacity_bytes()
    vmem_budget = (vmem_cap * 3) // 4
    big_vmem = vmem_cap > (96 << 20)

    # --- intermediate-dim tile (reduction axis) ---
    tk_req = tk if tk is not None else (512 if big_vmem else 256)
    tk, i_pad = _choose_tk(I, tk_req)
    I_p = I + i_pad
    nk = I_p // tk

    # --- token tile: bf16 packs 2 rows/sublane -> multiple of 16; prefer 256-multiples ---
    sub = 8 if xb >= 4 else 8 * (4 // xb)
    tm_target = tm if tm is not None else (1024 if big_vmem else 512)
    tm_fit = max(_round_up(tm_target, sub), sub)
    while tm_fit > 256 and _vmem_estimate(tm_fit, tk, H, xb, wb) > vmem_budget:
        tm_fit -= 256
    while tm_fit > sub and _vmem_estimate(tm_fit, tk, H, xb, wb) > vmem_budget:
        tm_fit -= sub
    tm_fit = max(tm_fit, sub)
    tm = min(tm_fit, _round_up(T, sub))

    grid_m = pl.cdiv(T, tm)  # ragged T handled via Pallas partial blocks (no jnp.pad)
    grid = (grid_m, nk)

    # --- fuse gate & up into per-k-block [gate_k | up_k] columns (one DMA + one dot) ---
    # TODO(synk): in production pre-fuse w_gu (and pad I) once at weight-load time.
    if i_pad:
        w_gate = jnp.pad(w_gate, ((0, 0), (0, i_pad)))
        w_up = jnp.pad(w_up, ((0, 0), (0, i_pad)))
        w_down = jnp.pad(w_down, ((0, i_pad), (0, 0)))
    w_gu = jnp.concatenate(
        [w_gate.reshape(H, nk, tk), w_up.reshape(H, nk, tk)], axis=2
    ).reshape(H, nk * 2 * tk)

    x2 = x.reshape(T, H)

    est = _vmem_estimate(tm, tk, H, xb, wb)
    vmem_limit = max(32 << 20, est + (4 << 20))
    vmem_limit = int(min(vmem_limit, (vmem_cap * 9) // 10))

    cost = pl.CostEstimate(
        flops=int(6 * T * H * I_p),
        transcendentals=int(T * I_p),
        bytes_accessed=int(3 * H * I_p * wb * grid_m + 2 * T * H * xb),
    )

    kernel = functools.partial(_swiglu_kernel, tk=tk)

    out2 = pl.pallas_call(
        kernel,
        out_shape=jax.ShapeDtypeStruct((T, H), x.dtype),
        grid_spec=pltpu.PrefetchScalarGridSpec(
            num_scalar_prefetch=0,
            grid=grid,
            in_specs=[
                pl.BlockSpec((tm, H), lambda i, k: (i, 0)),        # x tile
                pl.BlockSpec((H, 2 * tk), lambda i, k: (0, k)),    # fused [gate|up] block
                pl.BlockSpec((tk, H), lambda i, k: (k, 0)),        # down block
            ],
            out_specs=pl.BlockSpec((tm, H), lambda i, k: (i, 0)),
            scratch_shapes=[pltpu.VMEM((tm, H), jnp.float32)],
        ),
        compiler_params=pltpu.CompilerParams(
            dimension_semantics=("parallel", "arbitrary"),
            vmem_limit_bytes=vmem_limit,
        ),
        cost_estimate=cost,
    )(x2, w_gu, w_down)

    return out2.reshape(B, S, H)


def _reference(x, w_gate, w_up, w_down):
    xf = x.astype(jnp.float32)
    g = xf @ w_gate.astype(jnp.float32)
    u = xf @ w_up.astype(jnp.float32)
    h = jax.nn.silu(g) * u
    return (h @ w_down.astype(jnp.float32)).astype(x.dtype)


if __name__ == "__main__":
    key = jax.random.PRNGKey(0)

    # --- test 1: small f32 shapes, single reduction block ---
    B, S, H, I = 2, 8, 32, 64
    kx, kg, ku, kd, key = jax.random.split(key, 5)
    x = jax.random.normal(kx, (B, S, H), dtype=jnp.float32)
    w_gate = jax.random.normal(kg, (H, I), dtype=jnp.float32) * 0.05
    w_up = jax.random.normal(ku, (H, I), dtype=jnp.float32) * 0.05
    w_down = jax.random.normal(kd, (I, H), dtype=jnp.float32) * 0.05

    out = jax.block_until_ready(feed_forward(x, w_gate, w_up, w_down))
    ref = _reference(x, w_gate, w_up, w_down)
    assert out.shape == (B, S, H)
    assert jnp.allclose(out, ref, atol=1e-4, rtol=1e-4)

    # --- test 2: bf16, ragged token count (partial block), multi-step reduction ---
    B2, S2, H2, I2 = 2, 7, 64, 256
    kx2, kg2, ku2, kd2, key = jax.random.split(key, 5)
    x2 = jax.random.normal(kx2, (B2, S2, H2), dtype=jnp.float32).astype(jnp.bfloat16)
    w_gate2 = (jax.random.normal(kg2, (H2, I2), dtype=jnp.float32) * 0.05).astype(jnp.bfloat16)
    w_up2 = (jax.random.normal(ku2, (H2, I2), dtype=jnp.float32) * 0.05).astype(jnp.bfloat16)
    w_down2 = (jax.random.normal(kd2, (I2, H2), dtype=jnp.float32) * 0.05).astype(jnp.bfloat16)

    out2 = jax.block_until_ready(feed_forward(x2, w_gate2, w_up2, w_down2, tk=128))
    ref2 = _reference(x2, w_gate2, w_up2, w_down2)
    assert out2.shape == (B2, S2, H2)
    assert jnp.allclose(out2.astype(jnp.float32), ref2.astype(jnp.float32),
                        atol=3e-2, rtol=3e-2)

    print("KERNEL_OK")
</pallas_src>

<mosaic_0001>
module attributes {stable_mosaic.version = 11 : i64} {
  func.func @_swiglu_kernel(%arg0: i32, %arg1: i32, %arg2: memref<16x32xf32, #tpu.memory_space<vmem>>, %arg3: memref<32x128xf32, #tpu.memory_space<vmem>>, %arg4: memref<64x32xf32, #tpu.memory_space<vmem>>, %arg5: memref<16x32xf32, #tpu.memory_space<vmem>>, %arg6: memref<16x32xf32, #tpu.memory_space<vmem>>) attributes {dimension_semantics = [#tpu.dimension_semantics<parallel>, #tpu.dimension_semantics<arbitrary>], iteration_bounds = array<i64: 1, 1>, scalar_prefetch = 0 : i64, scratch_operands = 1 : i64, tpu.core_type = #tpu.core_type<tc>, window_params = [{transform_indices = @transform_0, window_bounds = array<i64: 16, 32>}, {transform_indices = @transform_1, window_bounds = array<i64: 32, 128>}, {transform_indices = @transform_2, window_bounds = array<i64: 64, 32>}, {transform_indices = @transform_3, window_bounds = array<i64: 16, 32>}]} {
    %c0_i32 = arith.constant 0 : i32
    %0 = arith.cmpi eq, %arg1, %c0_i32 : i32
    %1 = arith.extui %0 : i1 to i32
    %c0_i32_0 = arith.constant 0 : i32
    %2 = arith.cmpi ne, %1, %c0_i32_0 : i32
    scf.if %2 {
      %cst_12 = arith.constant 0.000000e+00 : f32
      %23 = vector.broadcast %cst_12 : f32 to vector<16x32xf32>
      %c0_13 = arith.constant 0 : index
      %c0_14 = arith.constant 0 : index
      %24 = vector.load %arg6[%c0_13, %c0_14] : memref<16x32xf32, #tpu.memory_space<vmem>>, vector<16x32xf32>
      tpu.vector_store %arg6[%c0_13, %c0_14], %23 {strides = array<i32>} : memref<16x32xf32, #tpu.memory_space<vmem>>, vector<16x32xf32>,
    } else {
    }
    %c0 = arith.constant 0 : index
    %c0_1 = arith.constant 0 : index
    %3 = vector.load %arg2[%c0, %c0_1] : memref<16x32xf32, #tpu.memory_space<vmem>>, vector<16x32xf32>
    %c0_2 = arith.constant 0 : index
    %c0_3 = arith.constant 0 : index
    %4 = vector.load %arg3[%c0_2, %c0_3] : memref<32x128xf32, #tpu.memory_space<vmem>>, vector<32x128xf32>
    %cst = arith.constant dense<0.000000e+00> : vector<16x128xf32>
    %5 = tpu.matmul %3, %4, %cst {dimension_numbers = #tpu.dot_dimension_numbers<[1], [0], [0], [1], [0, 0, 1, 1], [], []>} : vector<16x32xf32>, vector<32x128xf32>, vector<16x128xf32> -> vector<16x128xf32>
    %6 = vector.extract_strided_slice %5 {offsets = [0, 0], sizes = [16, 64], strides = [1, 1]} : vector<16x128xf32> to vector<16x64xf32>
    %7 = vector.extract_strided_slice %5 {offsets = [0, 64], sizes = [16, 64], strides = [1, 1]} : vector<16x128xf32> to vector<16x64xf32>
    %8 = arith.negf %6 : vector<16x64xf32>
    %9 = math.exp %8 : vector<16x64xf32>
    %cst_4 = arith.constant 1.000000e+00 : f32
    %10 = vector.broadcast %cst_4 : f32 to vector<16x64xf32>
    %11 = arith.addf %10, %9 : vector<16x64xf32>
    %12 = arith.divf %10, %11 : vector<16x64xf32>
    %13 = arith.mulf %6, %12 : vector<16x64xf32>
    %14 = arith.mulf %13, %7 : vector<16x64xf32>
    %c0_5 = arith.constant 0 : index
    %c0_6 = arith.constant 0 : index
    %15 = vector.load %arg4[%c0_5, %c0_6] : memref<64x32xf32, #tpu.memory_space<vmem>>, vector<64x32xf32>
    %cst_7 = arith.constant dense<0.000000e+00> : vector<16x32xf32>
    %16 = tpu.matmul %14, %15, %cst_7 {dimension_numbers = #tpu.dot_dimension_numbers<[1], [0], [0], [1], [0, 0, 1, 1], [], []>} : vector<16x64xf32>, vector<64x32xf32>, vector<16x32xf32> -> vector<16x32xf32>
    %c0_i32_8 = arith.constant 0 : i32
    %17 = arith.cmpi ne, %arg1, %c0_i32_8 : i32
    %18 = arith.extui %17 : i1 to i32
    %c0_i32_9 = arith.constant 0 : i32
    %19 = arith.cmpi ne, %18, %c0_i32_9 : i32
    scf.if %19 {
      %c0_12 = arith.constant 0 : index
      %c0_13 = arith.constant 0 : index
      %23 = vector.load %arg6[%c0_12, %c0_13] : memref<16x32xf32, #tpu.memory_space<vmem>>, vector<16x32xf32>
      %24 = arith.addf %23, %16 : vector<16x32xf32>
      %c0_14 = arith.constant 0 : index
      %c0_15 = arith.constant 0 : index
      %25 = vector.load %arg6[%c0_14, %c0_15] : memref<16x32xf32, #tpu.memory_space<vmem>>, vector<16x32xf32>
      tpu.vector_store %arg6[%c0_14, %c0_15], %24 {strides = array<i32>} : memref<16x32xf32, #tpu.memory_space<vmem>>, vector<16x32xf32>,
    } else {
    }
    %c0_i32_10 = arith.constant 0 : i32
    %20 = arith.cmpi eq, %arg1, %c0_i32_10 : i32
    %21 = arith.extui %20 : i1 to i32
    %c0_i32_11 = arith.constant 0 : i32
    %22 = arith.cmpi ne, %21, %c0_i32_11 : i32
    scf.if %22 {
      %c0_12 = arith.constant 0 : index
      %c0_13 = arith.constant 0 : index
      %23 = vector.load %arg6[%c0_12, %c0_13] : memref<16x32xf32, #tpu.memory_space<vmem>>, vector<16x32xf32>
      %24 = arith.addf %23, %16 : vector<16x32xf32>
      %c0_14 = arith.constant 0 : index
      %c0_15 = arith.constant 0 : index
      %25 = vector.load %arg5[%c0_14, %c0_15] : memref<16x32xf32, #tpu.memory_space<vmem>>, vector<16x32xf32>
      tpu.vector_store %arg5[%c0_14, %c0_15], %24 {strides = array<i32>} : memref<16x32xf32, #tpu.memory_space<vmem>>, vector<16x32xf32>,
    } else {
    }
    return
  }
  func.func @transform_0(%arg0: i32, %arg1: i32) -> (i32, i32) {
    %c0_i32 = arith.constant 0 : i32
    %c0_i32_0 = arith.constant 0 : i32
    return %arg0, %c0_i32 : i32, i32
  }
  func.func @transform_1(%arg0: i32, %arg1: i32) -> (i32, i32) {
    %c0_i32 = arith.constant 0 : i32
    %c0_i32_0 = arith.constant 0 : i32
    return %c0_i32, %arg1 : i32, i32
  }
  func.func @transform_2(%arg0: i32, %arg1: i32) -> (i32, i32) {
    %c0_i32 = arith.constant 0 : i32
    %c0_i32_0 = arith.constant 0 : i32
    return %arg1, %c0_i32 : i32, i32
  }
  func.func @transform_3(%arg0: i32, %arg1: i32) -> (i32, i32) {
    %c0_i32 = arith.constant 0 : i32
    %c0_i32_0 = arith.constant 0 : i32
    return %arg0, %c0_i32 : i32, i32
  }
}

</mosaic_0001>

<bundles_post_ra>
// kernel: tpu_custom_call.1
= control target key start
LH: loop header
LB: loop body
LE: loop exit
PB: predicated region body
PF: predicated region fallthrough
CT: control target
= control target key end

     0   :  { %vm19_vm0 = vcmask 261120   ;;  %v240_v2 = vmov 0.0   ;;  %s316_s0 = inlined_call_operand.vmem [shape: f32[16,32], index: 0, kind: input, shape index: {}]   ;;  %s317_s1 = inlined_call_operand.vmem [shape: f32[32,128], index: 1, kind: input, shape index: {}]   ;;  %s318_s2 = inlined_call_operand.vmem [shape: f32[64,32], index: 2, kind: input, shape index: {}]   ;;  %s319_s3 = inlined_call_operand.hbm [shape: f32[16,32], index: 3, kind: output, shape index: {}]  }
   0x1   :  { %v27_v0 = vld [vmem:[%s317_s1 + $0x18] sm:$0xff]  ;;  %v26_v1 = vld [vmem:[%s317_s1 + $0x10] sm:$0xff]  ;;  %20 = vst.msk [vmem:[#allocation2] sm:$0xff] %vm19_vm0, %v240_v2  ;;  %v25_v3 = vld [vmem:[%s317_s1 + $0x8] sm:$0xff] }
   0x2   :  { %47 = vmatpush.msra.mxu0 %v27_v0  ;;  %189 = vmatpush.msra.mxu3 %v27_v0  ;;  %21 = vst.msk [vmem:[#allocation2 + $0x8] sm:$0xff] %vm19_vm0, %v240_v2 }
   0x3   :  { %8 = vsyncpa [#allocation4], 0  ;;  %v24_v4 = vld [vmem:[%s317_s1] sm:$0xff]  ;;  %v23_v6 = vld [vmem:[%s316_s0 + $0x8] sm:$0xff]  ;;  %vm116_vm8 = vcmask 523264   ;;  %s171_s15 = sshll.u32 %s319_s3, 4  ;;  %s172_s15 = int_to_ptr.hbm [resolvable:$true] %s171_s15 }
   0x4   :  { %48 = vmatpush.msra.mxu0 %v26_v1  ;;  %190 = vmatpush.msra.mxu3 %v26_v1  ;;  %v22_v5 = vld [vmem:[%s316_s0] sm:$0xff]  ;;  %v115_v7 = vld [vmem:[%s318_s2 + $0x38] sm:$0xff]  ;;  %v114_v8 = vld [vmem:[%s318_s2 + $0x30] sm:$0xff]  ;;  %s241_s0 = smov 64   ;;  %s243_s16 = smov 128  }
   0x5   :  { %193 = vmatpush.msra.mxu2 %v115_v7  ;;  %131 = vmatpush.msra.mxu1 %v115_v7  ;;  %v113_v9 = vld [vmem:[%s318_s2 + $0x28] sm:$0xff]  ;;  %v112_v11 = vld [vmem:[%s318_s2 + $0x20] sm:$0xff]  ;;  %v111_v12 = vld [vmem:[%s318_s2 + $0x18] sm:$0xff]  ;;  %s244_s17 = smov 8  }
   0x6   :  { %49 = vmatpush.msra.mxu0 %v25_v3  ;;  %191 = vmatpush.msra.mxu3 %v25_v3  ;;  %v110_v13 = vld [vmem:[%s318_s2 + $0x10] sm:$0xff]  ;;  %v109_v14 = vld [vmem:[%s318_s2 + $0x8] sm:$0xff]  ;;  %v108_v21 = vld [vmem:[%s318_s2] sm:$0xff]  ;;  %s242_s2 = smov [#allocation3]  }
   0x7   :  { %194 = vmatpush.msra.mxu2 %v114_v8  ;;  %132 = vmatpush.msra.mxu1 %v114_v8  ;;  %s169_s12 = sshll.u32 %s242_s2, 4  ;;  %s170_s12 = int_to_ptr.vmem [resolvable:$true] %s169_s12 }
   0x8   :  { %50 = vmatpush.msra.mxu0 %v24_v4  ;;  %192 = vmatpush.msra.mxu3 %v24_v4  ;;  %v159_v51 = vld [vmem:[#allocation2] sm:$0xff] }
   0x9   :  { %183 = vmatmul.msk.f32.vlgmr.msra.gmra.mxu0 %vm19_vm0, %v22_v5  ;;  %184 = vmatmul.msk.f32.vlgmr.msra.gmra.mxu3 %vm19_vm0, %v23_v6  ;;  %v160_v49 = vld [vmem:[#allocation2 + $0x8] sm:$0xff] }
   0xa   :  { %195 = vmatpush.msra.mxu2 %v113_v9  ;;  %133 = vmatpush.msra.mxu1 %v113_v9 }
   0xc   :  { %196 = vmatpush.msra.mxu2 %v112_v11  ;;  %134 = vmatpush.msra.mxu1 %v112_v11 }
   0xe   :  { %197 = vmatpush.msra.mxu2 %v111_v12  ;;  %135 = vmatpush.msra.mxu1 %v111_v12 }
  0x10   :  { %198 = vmatpush.msra.mxu2 %v110_v13  ;;  %136 = vmatpush.msra.mxu1 %v110_v13 }
  0x12   :  { %199 = vmatpush.msra.mxu2 %v109_v14  ;;  %137 = vmatpush.msra.mxu1 %v109_v14 }
  0x14   :  { %200 = vmatpush.msra.mxu2 %v108_v21  ;;  %138 = vmatpush.msra.mxu1 %v108_v21 }
  0x86   :  { %v52_v15 = vpop.f32.mrf.mxu0 }
  0x87   :  { %v185_v17 = vmul.f32 -1.442695, %v52_v15 }
  0x8c   :  { %v55_v10 = vpop.f32.mrf.mxu3 }
  0x8d   :  { %102 = vrot.lane.b32.xlu0 %v55_v10, %s241_s0  ;;  %v186_v16 = vmul.f32 -1.442695, %v55_v10 }
  0x8f   :  { %206 = vpow2.f32 %v186_v16 }
  0x90   :  { %208 = vpow2.f32 %v185_v17 }
  0x95   :  { %100 = vrot.lane.b32.xlu0 %v52_v15, %s241_s0  ;;  %v207_v18 = vpop.eup %206 }
  0x96   :  { %v65_v19 = vadd.f32 1.0, %v207_v18  ;;  %v209_v20 = vpop.eup %208 }
  0x97   :  { %v64_v22 = vadd.f32 1.0, %v209_v20 }
  0x98   :  { %210 = vrcp.f32 %v65_v19  ;;  %v92_v31 = vand.u32 2147483648, %v65_v19  ;;  %vm86_vm2 = vweird.f32 %v65_v19  ;;  %v90_v32 = vand.u32 2147483647, %v65_v19 }
  0x99   :  { %212 = vrcp.f32 %v64_v22  ;;  %vm71_vm4 = vweird.f32 %v64_v22  ;;  %v77_v36 = vand.u32 2147483648, %v64_v22  ;;  %v75_v39 = vand.u32 2147483647, %v64_v22 }
  0x9a   :  { %v93_v35 = vor.u32 1.1754944e-38, %v92_v31  ;;  %vm91_vm6 = vcmp.eq.f32.partialorder %v90_v32, 8.507059e+37 }
  0x9b   :  { %v78_v41 = vor.u32 1.1754944e-38, %v77_v36  ;;  %vm76_vm9 = vcmp.eq.f32.partialorder %v75_v39, 8.507059e+37 }
  0x9e   :  { %v211_v23 = vpop.eup %210 }
  0x9f   :  { %v82_v24 = vmul.f32 %v211_v23, %v65_v19  ;;  %v213_v26 = vpop.eup %212  ;;  %vm87_vm1 = vweird.f32 %v211_v23 }
  0xa0   :  { %v67_v27 = vmul.f32 %v213_v26, %v64_v22  ;;  %vm88_vm3 = vmor %vm86_vm2, %vm87_vm1  ;;  %vm72_vm5 = vweird.f32 %v213_v26 }
  0xa1   :  { %v83_v25 = vsub.f32 1.0, %v82_v24  ;;  %vm73_vm7 = vmor %vm71_vm4, %vm72_vm5 }
  0xa2   :  { %v68_v29 = vsub.f32 1.0, %v67_v27 }
  0xa3   :  { %v84_v28 = vmul.f32 %v211_v23, %v83_v25 }
  0xa4   :  { %v69_v33 = vmul.f32 %v213_v26, %v68_v29 }
  0xa5   :  { %v85_v30 = vadd.f32 %v211_v23, %v84_v28 }
  0xa6   :  { %v70_v38 = vadd.f32 %v213_v26, %v69_v33 }
  0xa7   :  { %v89_v34 = vsel %vm88_vm3, %v211_v23, %v85_v30 }
  0xa8   :  { %v94_v37 = vsel %vm91_vm6, %v93_v35, %v89_v34  ;;  %v74_v43 = vsel %vm73_vm7, %v213_v26, %v70_v38 }
  0xa9   :  { %v97_v40 = vmul.f32 %v94_v37, %v55_v10  ;;  %v79_v45 = vsel %vm76_vm9, %v78_v41, %v74_v43 }
  0xaa   :  { %v96_v46 = vmul.f32 %v79_v45, %v52_v15 }
  0xff   :  { %v103_v42 = vpop.permute.xlu0 %102 }
 0x100   :  { %v107_v44 = vmul.f32 %v103_v42, %v97_v40 }
 0x102   :  { %188 = vmatmul.msk.f32.vlgmr.msra.gmra.mxu2 %vm116_vm8, %v107_v44 }
 0x107   :  { %v101_v47 = vpop.permute.xlu0 %100 }
 0x108   :  { %v106_v48 = vmul.f32 %v101_v47, %v96_v46 }
 0x10a   :  { %187 = vmatmul.msk.f32.vlgmr.msra.gmra.mxu1 %vm116_vm8, %v106_v48 }
 0x185   :  { %v143_v50 = vpop.f32.mrf.mxu2 }
 0x186   :  { %v162_v52 = vadd.f32 %v160_v49, %v143_v50 }
 0x187   :  { %v140_v53 = vpop.f32.mrf.mxu1 }
 0x188   :  { %164 = vst.msk [vmem:[#allocation3 + $0x8] sm:$0xff] %vm19_vm0, %v162_v52  ;;  %v161_v54 = vadd.f32 %v159_v51, %v140_v53 }
 0x18a   :  { %163 = vst.msk [vmem:[#allocation3] sm:$0xff] %vm19_vm0, %v161_v54 }
 0x18b   :  { %177 = dma.vmem_to_hbm [thread:$0]  %s170_s12, 256, %s172_s15, [#allocation4], %s243_s16, %s243_s16, %s244_s17  }
 0x18c   :  { %238 = dma.done.wait [#allocation4], 256  }
 0x18d   :  { %239 = vsyncadd [#allocation4], 4294967040 }
 0x18e   :  { %182 = vsyncpa [#allocation4], 1 }

</bundles_post_ra>
